<compile_context>
chip_gen: v7x
topology: tpu7x:2x2x1
jax: 0.10.0
libtpu: 0.0.40
codegen_flags: <defaults>
</compile_context>

<pallas_src>
import functools
import math

import jax
import jax.numpy as jnp
from jax.experimental import pallas as pl
from jax.experimental.pallas import tpu as pltpu


_SQRT_2_OVER_PI = math.sqrt(2.0 / math.pi)
_OUT_PAD = 128           # lane-dense padded output width (real outputs = 3)
_NEG_BIG = -1e30         # bias for padded logit columns

# Compat shim: modern jax uses pltpu.CompilerParams.
_CompilerParams = getattr(pltpu, "CompilerParams", None) or getattr(
    pltpu, "TPUCompilerParams")


def _gelu_tanh(x, *, via_sigmoid=True):
    """nn.GELU(approximate='tanh').

    via_sigmoid=True uses tanh(z) = 2*sigmoid(2z) - 1, i.e.
      gelu(x) = x * sigmoid(2*sqrt(2/pi)*(x + 0.044715*x^3))
    which folds away the 0.5* and (1+t) VALU ops (EUP has slack).
    """
    inner = x + 0.044715 * (x * x * x)
    if via_sigmoid:
        return x * jax.nn.sigmoid((2.0 * _SQRT_2_OVER_PI) * inner)
    return 0.5 * x * (1.0 + jnp.tanh(_SQRT_2_OVER_PI * inner))


def _round_up(n, m):
    return ((n + m - 1) // m) * m


def _has_bf16_vpu():
    """True on chips with a bf16 VPU/EUP (v6e, v7x); False on v2-v5."""
    try:
        kind = jax.devices()[0].device_kind.lower()
    except Exception:
        return False
    return not any(t in kind for t in ("v2", "v3", "v4", "v5"))


def game_brain_kernel(x_ref, w_in_ref, w1_ref, b1_ref, ln_g_ref, ln_b_ref,
                      w_out_ref, b_out_ref, o_ref, *, ew_dtype, via_sigmoid):
    H = w_in_ref.shape[1]
    inv_h = 1.0 / H

    # fc_in (no bias): bf16 operands on the MXU, f32 accumulation.
    h = jnp.dot(x_ref[...], w_in_ref[...], preferred_element_type=jnp.float32)

    # gelu(tanh) in the elementwise dtype (bf16 on v6e/v7x for 2x VALU
    # throughput, f32 on v5e).  LN statistics / rsqrt stay in f32.
    h_e = h.astype(ew_dtype)
    g = _gelu_tanh(h_e, via_sigmoid=via_sigmoid)

    # Two-pass LayerNorm statistics (f32 accumulation): robust to mean^2 >> var.
    mu = jnp.sum(g, axis=-1, keepdims=True, dtype=jnp.float32) * inv_h
    d = g - mu.astype(ew_dtype)
    var = jnp.sum(d * d, axis=-1, keepdims=True, dtype=jnp.float32) * inv_h
    inv_sigma = jax.lax.rsqrt(var + 1e-5)                    # f32, (TB, 1)

    ln = d * inv_sigma.astype(ew_dtype) * ln_g_ref[...].astype(ew_dtype) \
        + ln_b_ref[...].astype(ew_dtype)
    hr = (h_e + ln).astype(jnp.bfloat16)                     # residual -> fc1

    # fc1 + bias -> gelu.  Dropout(0.1) is identity here.
    # TODO(synk): train-mode stochastic dropout is not reproduced.
    h1 = jnp.dot(hr, w1_ref[...], preferred_element_type=jnp.float32)
    h1 = _gelu_tanh(h1.astype(ew_dtype) + b1_ref[...].astype(ew_dtype),
                    via_sigmoid=via_sigmoid)

    # fc_out + bias (head padded to 128 lanes; padded bias columns hold -1e30
    # so they vanish from the softmax normalization -> lane-dense store).
    logits = jnp.dot(h1.astype(jnp.bfloat16), w_out_ref[...],
                     preferred_element_type=jnp.float32) + b_out_ref[...]

    # Stable log_softmax over the last dim, f32.
    m = jnp.max(logits, axis=-1, keepdims=True)
    z = logits - m
    lse = jnp.log(jnp.sum(jnp.exp(z), axis=-1, keepdims=True))
    o_ref[...] = (z - lse).astype(o_ref.dtype)


def _game_brain_call(x, params, *, out_size, block_batch, ew_bf16,
                     via_sigmoid, single_buffer_consts):
    B, in_size = x.shape
    w_in, w1, b1 = params["w_in"], params["w1"], params["b1"]
    ln_g, ln_b = params["ln_g"], params["ln_b"]
    w_out_p, b_out_p = params["w_out_pad"], params["b_out_pad"]
    H = w_in.shape[1]

    # ---- batch tiling --------------------------------------------------------
    #  * sublane-align to 16 (safe tiling for the bf16 x / output blocks)
    #  * produce >= 2 tiles whenever the batch allows it so the "parallel"
    #    grid axis can shard across both v7x TensorCores
    #  * cap at block_batch (keep <= 512 on v5e: single vector-store slot).
    ALIGN = 16
    Bp = _round_up(B, ALIGN)
    TB = min(block_batch, max(ALIGN, _round_up(pl.cdiv(Bp, 2), ALIGN)))
    Bp = _round_up(B, TB)
    grid = (Bp // TB,)

    x = x.astype(jnp.bfloat16)            # matmul operand dtype; halves x DMA
    if Bp != B:
        x = jnp.pad(x, ((0, Bp - B), (0, 0)))

    # ---- BlockSpecs ----------------------------------------------------------
    use_single_buf = single_buffer_consts and hasattr(pl, "Buffered")

    def const_spec(shape):
        nd = len(shape)
        idx = lambda i, _nd=nd: (0,) * _nd
        if use_single_buf:
            # Constant index_map => never re-fetched; one VMEM buffer suffices
            # (the default pipeline would double-buffer every weight).
            return pl.BlockSpec(shape, idx, pipeline_mode=pl.Buffered(1))
        return pl.BlockSpec(shape, idx)

    # ---- cost / VMEM bookkeeping --------------------------------------------
    const_bytes = sum(int(p.size) * p.dtype.itemsize
                      for p in (w_in, w1, b1, ln_g, ln_b, w_out_p, b_out_p))
    flops = 2 * Bp * (in_size * H + H * H + H * _OUT_PAD)
    # 2H gelu gates + OUT_PAD softmax exps + rsqrt + log per row.
    transcendentals = Bp * (2 * H + _OUT_PAD + 2)
    bytes_accessed = (x.size * x.dtype.itemsize + const_bytes
                      + Bp * _OUT_PAD * 2)

    ew_bytes = 2 if ew_bf16 else 4
    vmem_need = ((1 if use_single_buf else 2) * const_bytes
                 + 2 * TB * (in_size + _OUT_PAD) * 2          # pipelined x/out
                 + TB * H * (4 + 3 * ew_bytes)                # live intermediates
                 + TB * _OUT_PAD * 4)
    vmem_limit = None
    if vmem_need > (16 << 20):            # above the smallest default scope
        vmem_limit = int(min(48 << 20, 2 * vmem_need))

    kernel = functools.partial(
        game_brain_kernel,
        ew_dtype=jnp.bfloat16 if ew_bf16 else jnp.float32,
        via_sigmoid=via_sigmoid)

    out = pl.pallas_call(
        kernel,
        out_shape=jax.ShapeDtypeStruct((Bp, _OUT_PAD), jnp.bfloat16),
        grid=grid,
        in_specs=[
            pl.BlockSpec((TB, in_size), lambda i: (i, 0)),    # x: streamed tiles
            const_spec(w_in.shape), const_spec(w1.shape), const_spec(b1.shape),
            const_spec(ln_g.shape), const_spec(ln_b.shape),
            const_spec(w_out_p.shape), const_spec(b_out_p.shape),
        ],
        out_specs=pl.BlockSpec((TB, _OUT_PAD), lambda i: (i, 0)),
        compiler_params=_CompilerParams(
            dimension_semantics=("parallel",),
            vmem_limit_bytes=vmem_limit),
        cost_estimate=pl.CostEstimate(
            flops=flops, transcendentals=transcendentals,
            bytes_accessed=bytes_accessed),
    )(x, w_in, w1, b1, ln_g, ln_b, w_out_p, b_out_p)

    # bf16 HBM writeback of the padded 128-lane head; only the first `out_size`
    # columns are meaningful (the pads hold ~-1e30).  Slice and return f32.
    return out[:B, :out_size].astype(jnp.float32)


def game_brain_forward(x, params, *, out_size=3, block_batch=512):
    """Fused GameBrain forward. Returns (B, out_size) float32 log-probs."""
    try:
        out = _game_brain_call(x, params, out_size=out_size,
                               block_batch=block_batch,
                               ew_bf16=_has_bf16_vpu(),
                               via_sigmoid=True,
                               single_buffer_consts=True)
        # Block here so any lowering/runtime rejection of the fast path is
        # caught and we retry with the conservative build.
        return jax.block_until_ready(out)
    except Exception:
        return _game_brain_call(x, params, out_size=out_size,
                                block_batch=block_batch,
                                ew_bf16=False, via_sigmoid=False,
                                single_buffer_consts=False)


def init_params(key, input_size, hidden_size, out_size=3):
    """Deterministic init mirroring GameBrain._init_weights (shapes only)."""
    k_in, k1, k_out = jax.random.split(key, 3)
    # fc_in: normal(0, 0.02); stored transposed (in, hidden)
    w_in = 0.02 * jax.random.normal(k_in, (input_size, hidden_size), jnp.float32)
    # fc1: kaiming normal, fan_in, relu -> std = sqrt(2/fan_in)
    w1 = math.sqrt(2.0 / hidden_size) * jax.random.normal(
        k1, (hidden_size, hidden_size), jnp.float32)
    b1 = jnp.zeros((1, hidden_size), jnp.float32)
    # fc_out: normal(0, 0.01)
    w_out = 0.01 * jax.random.normal(k_out, (hidden_size, out_size), jnp.float32)
    b_out = jnp.zeros((1, out_size), jnp.float32)
    # LayerNorm affine (defaults: gamma=1, beta=0)
    ln_g = jnp.ones((1, hidden_size), jnp.float32)
    ln_b = jnp.zeros((1, hidden_size), jnp.float32)

    # Lane-dense padding of the 3-wide head: zero weight columns + -1e30 bias
    # on the pads so they never affect the softmax normalization.
    w_out_pad = jnp.zeros((hidden_size, _OUT_PAD), jnp.float32)
    w_out_pad = w_out_pad.at[:, :out_size].set(w_out)
    b_out_pad = jnp.full((1, _OUT_PAD), _NEG_BIG, jnp.float32)
    b_out_pad = b_out_pad.at[:, :out_size].set(b_out)

    return dict(
        # bf16 weights halve HBM/VMEM traffic; matmuls accumulate in f32.
        w_in=w_in.astype(jnp.bfloat16),
        w1=w1.astype(jnp.bfloat16),
        w_out_pad=w_out_pad.astype(jnp.bfloat16),
        b1=b1, ln_g=ln_g, ln_b=ln_b, b_out_pad=b_out_pad,
        # f32 copies kept only for the pure-JAX reference check below.
        w_in_f32=w_in, w1_f32=w1, w_out_f32=w_out, b_out_f32=b_out,
    )


def game_brain_reference(x, params):
    """Pure-JAX f32 reference of GameBrain.forward (eval mode)."""
    h = x @ params["w_in_f32"]
    g = _gelu_tanh(h, via_sigmoid=False)
    mu = jnp.mean(g, axis=-1, keepdims=True)
    var = jnp.mean((g - mu) ** 2, axis=-1, keepdims=True)
    ln = (g - mu) * jax.lax.rsqrt(var + 1e-5) * params["ln_g"] + params["ln_b"]
    h = h + ln
    h1 = _gelu_tanh(h @ params["w1_f32"] + params["b1"], via_sigmoid=False)
    logits = h1 @ params["w_out_f32"] + params["b_out_f32"]
    return jax.nn.log_softmax(logits, axis=-1)


if __name__ == "__main__":
    # GameConfig().get_inputsize() = 1 + 3*3 = 10; small hidden for the demo
    # (module default is 512 — same kernel handles it, just change hidden_size).
    batch = 8
    input_size = 10
    hidden_size = 128

    key = jax.random.PRNGKey(0)
    k_x, k_p = jax.random.split(key)
    x = jax.random.normal(k_x, (batch, input_size), jnp.float32)
    params = init_params(k_p, input_size, hidden_size)

    out = jax.block_until_ready(game_brain_forward(x, params))

    assert out.shape == (batch, 3)
    # log-probabilities should sum (in prob space) to ~1 per row
    # (bf16 output store => slightly looser tolerance than f32).
    assert bool(jnp.all(jnp.abs(jnp.sum(jnp.exp(out), axis=-1) - 1.0) < 2e-2))
    # matches the f32 reference up to bf16-matmul / bf16-store tolerance
    ref = game_brain_reference(x, params)
    assert bool(jnp.max(jnp.abs(out - ref)) < 2e-2)
    print("KERNEL_OK")
</pallas_src>

<mosaic_0001>
module attributes {stable_mosaic.version = 11 : i64} {
  func.func @game_brain_kernel(%arg0: i32, %arg1: memref<16x10xbf16, #tpu.memory_space<vmem>>, %arg2: memref<10x128xbf16, #tpu.memory_space<vmem>>, %arg3: memref<128x128xbf16, #tpu.memory_space<vmem>>, %arg4: memref<1x128xf32, #tpu.memory_space<vmem>>, %arg5: memref<1x128xf32, #tpu.memory_space<vmem>>, %arg6: memref<1x128xf32, #tpu.memory_space<vmem>>, %arg7: memref<128x128xbf16, #tpu.memory_space<vmem>>, %arg8: memref<1x128xf32, #tpu.memory_space<vmem>>, %arg9: memref<16x128xbf16, #tpu.memory_space<vmem>>) attributes {dimension_semantics = [#tpu.dimension_semantics<parallel>], iteration_bounds = array<i64: 1>, scalar_prefetch = 0 : i64, scratch_operands = 0 : i64, tpu.core_type = #tpu.core_type<tc>, window_params = [{transform_indices = @transform_0, window_bounds = array<i64: 16, 10>}, {pipeline_mode = #tpu.pipeline_mode<synchronous>, transform_indices = @transform_1, window_bounds = array<i64: 10, 128>}, {pipeline_mode = #tpu.pipeline_mode<synchronous>, transform_indices = @transform_2, window_bounds = array<i64: 128, 128>}, {pipeline_mode = #tpu.pipeline_mode<synchronous>, transform_indices = @transform_3, window_bounds = array<i64: 1, 128>}, {pipeline_mode = #tpu.pipeline_mode<synchronous>, transform_indices = @transform_4, window_bounds = array<i64: 1, 128>}, {pipeline_mode = #tpu.pipeline_mode<synchronous>, transform_indices = @transform_5, window_bounds = array<i64: 1, 128>}, {pipeline_mode = #tpu.pipeline_mode<synchronous>, transform_indices = @transform_6, window_bounds = array<i64: 128, 128>}, {pipeline_mode = #tpu.pipeline_mode<synchronous>, transform_indices = @transform_7, window_bounds = array<i64: 1, 128>}, {transform_indices = @transform_8, window_bounds = array<i64: 16, 128>}]} {
    %c0 = arith.constant 0 : index
    %c0_0 = arith.constant 0 : index
    %0 = vector.load %arg1[%c0, %c0_0] : memref<16x10xbf16, #tpu.memory_space<vmem>>, vector<16x10xbf16>
    %c0_1 = arith.constant 0 : index
    %c0_2 = arith.constant 0 : index
    %1 = vector.load %arg2[%c0_1, %c0_2] : memref<10x128xbf16, #tpu.memory_space<vmem>>, vector<10x128xbf16>
    %cst = arith.constant dense<0.000000e+00> : vector<16x128xf32>
    %2 = tpu.matmul %0, %1, %cst {dimension_numbers = #tpu.dot_dimension_numbers<[1], [0], [0], [1], [0, 0, 1, 1], [], []>} : vector<16x10xbf16>, vector<10x128xbf16>, vector<16x128xf32> -> vector<16x128xf32>
    %3 = arith.truncf %2 : vector<16x128xf32> to vector<16x128xbf16>
    %4 = arith.mulf %3, %3 : vector<16x128xbf16>
    %5 = arith.mulf %4, %3 : vector<16x128xbf16>
    %cst_3 = arith.constant 4.467770e-02 : bf16
    %6 = vector.broadcast %cst_3 : bf16 to vector<16x128xbf16>
    %7 = arith.mulf %6, %5 : vector<16x128xbf16>
    %8 = arith.addf %3, %7 : vector<16x128xbf16>
    %cst_4 = arith.constant 1.593750e+00 : bf16
    %9 = vector.broadcast %cst_4 : bf16 to vector<16x128xbf16>
    %10 = arith.mulf %9, %8 : vector<16x128xbf16>
    %11 = arith.negf %10 : vector<16x128xbf16>
    %12 = math.exp %11 : vector<16x128xbf16>
    %cst_5 = arith.constant 1.000000e+00 : bf16
    %13 = vector.broadcast %cst_5 : bf16 to vector<16x128xbf16>
    %14 = arith.addf %13, %12 : vector<16x128xbf16>
    %15 = arith.divf %13, %14 : vector<16x128xbf16>
    %16 = arith.mulf %3, %15 : vector<16x128xbf16>
    %17 = arith.extf %16 : vector<16x128xbf16> to vector<16x128xf32>
    %cst_6 = arith.constant dense<0.000000e+00> : vector<16xf32>
    %18 = vector.multi_reduction <add>, %17, %cst_6 [1] : vector<16x128xf32> to vector<16xf32>
    %19 = vector.shape_cast %18 : vector<16xf32> to vector<16x1xf32>
    %cst_7 = arith.constant 7.812500e-03 : f32
    %20 = vector.broadcast %cst_7 : f32 to vector<16x1xf32>
    %21 = arith.mulf %19, %20 : vector<16x1xf32>
    %22 = arith.truncf %21 : vector<16x1xf32> to vector<16x1xbf16>
    %23 = vector.broadcast %22 : vector<16x1xbf16> to vector<16x128xbf16>
    %24 = arith.subf %16, %23 : vector<16x128xbf16>
    %25 = arith.mulf %24, %24 : vector<16x128xbf16>
    %26 = arith.extf %25 : vector<16x128xbf16> to vector<16x128xf32>
    %cst_8 = arith.constant dense<0.000000e+00> : vector<16xf32>
    %27 = vector.multi_reduction <add>, %26, %cst_8 [1] : vector<16x128xf32> to vector<16xf32>
    %28 = vector.shape_cast %27 : vector<16xf32> to vector<16x1xf32>
    %cst_9 = arith.constant 7.812500e-03 : f32
    %29 = vector.broadcast %cst_9 : f32 to vector<16x1xf32>
    %30 = arith.mulf %28, %29 : vector<16x1xf32>
    %cst_10 = arith.constant 9.99999974E-6 : f32
    %31 = vector.broadcast %cst_10 : f32 to vector<16x1xf32>
    %32 = arith.addf %30, %31 : vector<16x1xf32>
    %33 = math.rsqrt %32 : vector<16x1xf32>
    %34 = arith.truncf %33 : vector<16x1xf32> to vector<16x1xbf16>
    %35 = vector.broadcast %34 : vector<16x1xbf16> to vector<16x128xbf16>
    %36 = arith.mulf %24, %35 : vector<16x128xbf16>
    %c0_11 = arith.constant 0 : index
    %c0_12 = arith.constant 0 : index
    %37 = vector.load %arg5[%c0_11, %c0_12] : memref<1x128xf32, #tpu.memory_space<vmem>>, vector<1x128xf32>
    %38 = arith.truncf %37 : vector<1x128xf32> to vector<1x128xbf16>
    %39 = vector.broadcast %38 : vector<1x128xbf16> to vector<16x128xbf16>
    %40 = arith.mulf %36, %39 : vector<16x128xbf16>
    %c0_13 = arith.constant 0 : index
    %c0_14 = arith.constant 0 : index
    %41 = vector.load %arg6[%c0_13, %c0_14] : memref<1x128xf32, #tpu.memory_space<vmem>>, vector<1x128xf32>
    %42 = arith.truncf %41 : vector<1x128xf32> to vector<1x128xbf16>
    %43 = vector.broadcast %42 : vector<1x128xbf16> to vector<16x128xbf16>
    %44 = arith.addf %40, %43 : vector<16x128xbf16>
    %45 = arith.addf %3, %44 : vector<16x128xbf16>
    %c0_15 = arith.constant 0 : index
    %c0_16 = arith.constant 0 : index
    %46 = vector.load %arg3[%c0_15, %c0_16] : memref<128x128xbf16, #tpu.memory_space<vmem>>, vector<128x128xbf16>
    %cst_17 = arith.constant dense<0.000000e+00> : vector<16x128xf32>
    %47 = tpu.matmul %45, %46, %cst_17 {dimension_numbers = #tpu.dot_dimension_numbers<[1], [0], [0], [1], [0, 0, 1, 1], [], []>} : vector<16x128xbf16>, vector<128x128xbf16>, vector<16x128xf32> -> vector<16x128xf32>
    %48 = arith.truncf %47 : vector<16x128xf32> to vector<16x128xbf16>
    %c0_18 = arith.constant 0 : index
    %c0_19 = arith.constant 0 : index
    %49 = vector.load %arg4[%c0_18, %c0_19] : memref<1x128xf32, #tpu.memory_space<vmem>>, vector<1x128xf32>
    %50 = arith.truncf %49 : vector<1x128xf32> to vector<1x128xbf16>
    %51 = vector.broadcast %50 : vector<1x128xbf16> to vector<16x128xbf16>
    %52 = arith.addf %48, %51 : vector<16x128xbf16>
    %53 = arith.mulf %52, %52 : vector<16x128xbf16>
    %54 = arith.mulf %53, %52 : vector<16x128xbf16>
    %cst_20 = arith.constant 4.467770e-02 : bf16
    %55 = vector.broadcast %cst_20 : bf16 to vector<16x128xbf16>
    %56 = arith.mulf %55, %54 : vector<16x128xbf16>
    %57 = arith.addf %52, %56 : vector<16x128xbf16>
    %cst_21 = arith.constant 1.593750e+00 : bf16
    %58 = vector.broadcast %cst_21 : bf16 to vector<16x128xbf16>
    %59 = arith.mulf %58, %57 : vector<16x128xbf16>
    %60 = arith.negf %59 : vector<16x128xbf16>
    %61 = math.exp %60 : vector<16x128xbf16>
    %cst_22 = arith.constant 1.000000e+00 : bf16
    %62 = vector.broadcast %cst_22 : bf16 to vector<16x128xbf16>
    %63 = arith.addf %62, %61 : vector<16x128xbf16>
    %64 = arith.divf %62, %63 : vector<16x128xbf16>
    %65 = arith.mulf %52, %64 : vector<16x128xbf16>
    %c0_23 = arith.constant 0 : index
    %c0_24 = arith.constant 0 : index
    %66 = vector.load %arg7[%c0_23, %c0_24] : memref<128x128xbf16, #tpu.memory_space<vmem>>, vector<128x128xbf16>
    %cst_25 = arith.constant dense<0.000000e+00> : vector<16x128xf32>
    %67 = tpu.matmul %65, %66, %cst_25 {dimension_numbers = #tpu.dot_dimension_numbers<[1], [0], [0], [1], [0, 0, 1, 1], [], []>} : vector<16x128xbf16>, vector<128x128xbf16>, vector<16x128xf32> -> vector<16x128xf32>
    %c0_26 = arith.constant 0 : index
    %c0_27 = arith.constant 0 : index
    %68 = vector.load %arg8[%c0_26, %c0_27] : memref<1x128xf32, #tpu.memory_space<vmem>>, vector<1x128xf32>
    %69 = vector.broadcast %68 : vector<1x128xf32> to vector<16x128xf32>
    %70 = arith.addf %67, %69 : vector<16x128xf32>
    %cst_28 = arith.constant dense<0xFF800000> : vector<16xf32>
    %71 = vector.multi_reduction <maximumf>, %70, %cst_28 [1] : vector<16x128xf32> to vector<16xf32>
    %72 = vector.shape_cast %71 : vector<16xf32> to vector<16x1xf32>
    %73 = vector.broadcast %72 : vector<16x1xf32> to vector<16x128xf32>
    %74 = arith.subf %70, %73 : vector<16x128xf32>
    %75 = math.exp %74 : vector<16x128xf32>
    %cst_29 = arith.constant dense<0.000000e+00> : vector<16xf32>
    %76 = vector.multi_reduction <add>, %75, %cst_29 [1] : vector<16x128xf32> to vector<16xf32>
    %77 = vector.shape_cast %76 : vector<16xf32> to vector<16x1xf32>
    %78 = math.log %77 : vector<16x1xf32>
    %79 = vector.broadcast %78 : vector<16x1xf32> to vector<16x128xf32>
    %80 = arith.subf %74, %79 : vector<16x128xf32>
    %81 = arith.truncf %80 : vector<16x128xf32> to vector<16x128xbf16>
    %c0_30 = arith.constant 0 : index
    %c0_31 = arith.constant 0 : index
    %82 = vector.load %arg9[%c0_30, %c0_31] : memref<16x128xbf16, #tpu.memory_space<vmem>>, vector<16x128xbf16>
    tpu.vector_store %arg9[%c0_30, %c0_31], %81 {strides = array<i32>} : memref<16x128xbf16, #tpu.memory_space<vmem>>, vector<16x128xbf16>,
    return
  }
  func.func @transform_0(%arg0: i32) -> (i32, i32) {
    %c0_i32 = arith.constant 0 : i32
    %c0_i32_0 = arith.constant 0 : i32
    return %arg0, %c0_i32 : i32, i32
  }
  func.func @transform_1(%arg0: i32) -> (i32, i32) {
    %c0_i32 = arith.constant 0 : i32
    %c0_i32_0 = arith.constant 0 : i32
    %c0_i32_1 = arith.constant 0 : i32
    return %c0_i32, %c0_i32_0 : i32, i32
  }
  func.func @transform_2(%arg0: i32) -> (i32, i32) {
    %c0_i32 = arith.constant 0 : i32
    %c0_i32_0 = arith.constant 0 : i32
    %c0_i32_1 = arith.constant 0 : i32
    return %c0_i32, %c0_i32_0 : i32, i32
  }
  func.func @transform_3(%arg0: i32) -> (i32, i32) {
    %c0_i32 = arith.constant 0 : i32
    %c0_i32_0 = arith.constant 0 : i32
    %c0_i32_1 = arith.constant 0 : i32
    return %c0_i32, %c0_i32_0 : i32, i32
  }
  func.func @transform_4(%arg0: i32) -> (i32, i32) {
    %c0_i32 = arith.constant 0 : i32
    %c0_i32_0 = arith.constant 0 : i32
    %c0_i32_1 = arith.constant 0 : i32
    return %c0_i32, %c0_i32_0 : i32, i32
  }
  func.func @transform_5(%arg0: i32) -> (i32, i32) {
    %c0_i32 = arith.constant 0 : i32
    %c0_i32_0 = arith.constant 0 : i32
    %c0_i32_1 = arith.constant 0 : i32
    return %c0_i32, %c0_i32_0 : i32, i32
  }
  func.func @transform_6(%arg0: i32) -> (i32, i32) {
    %c0_i32 = arith.constant 0 : i32
    %c0_i32_0 = arith.constant 0 : i32
    %c0_i32_1 = arith.constant 0 : i32
    return %c0_i32, %c0_i32_0 : i32, i32
  }
  func.func @transform_7(%arg0: i32) -> (i32, i32) {
    %c0_i32 = arith.constant 0 : i32
    %c0_i32_0 = arith.constant 0 : i32
    %c0_i32_1 = arith.constant 0 : i32
    return %c0_i32, %c0_i32_0 : i32, i32
  }
  func.func @transform_8(%arg0: i32) -> (i32, i32) {
    %c0_i32 = arith.constant 0 : i32
    %c0_i32_0 = arith.constant 0 : i32
    return %arg0, %c0_i32 : i32, i32
  }
}

module attributes {stable_mosaic.version = 11 : i64} {
  func.func @game_brain_kernel(%arg0: i32, %arg1: memref<16x10xbf16, #tpu.memory_space<vmem>>, %arg2: memref<10x128xbf16, #tpu.memory_space<vmem>>, %arg3: memref<128x128xbf16, #tpu.memory_space<vmem>>, %arg4: memref<1x128xf32, #tpu.memory_space<vmem>>, %arg5: memref<1x128xf32, #tpu.memory_space<vmem>>, %arg6: memref<1x128xf32, #tpu.memory_space<vmem>>, %arg7: memref<128x128xbf16, #tpu.memory_space<vmem>>, %arg8: memref<1x128xf32, #tpu.memory_space<vmem>>, %arg9: memref<16x128xbf16, #tpu.memory_space<vmem>>) attributes {dimension_semantics = [#tpu.dimension_semantics<parallel>], iteration_bounds = array<i64: 1>, scalar_prefetch = 0 : i64, scratch_operands = 0 : i64, tpu.core_type = #tpu.core_type<tc>, window_params = [{transform_indices = @transform_0, window_bounds = array<i64: 16, 10>}, {pipeline_mode = #tpu.pipeline_mode<synchronous>, transform_indices = @transform_1, window_bounds = array<i64: 10, 128>}, {pipeline_mode = #tpu.pipeline_mode<synchronous>, transform_indices = @transform_2, window_bounds = array<i64: 128, 128>}, {pipeline_mode = #tpu.pipeline_mode<synchronous>, transform_indices = @transform_3, window_bounds = array<i64: 1, 128>}, {pipeline_mode = #tpu.pipeline_mode<synchronous>, transform_indices = @transform_4, window_bounds = array<i64: 1, 128>}, {pipeline_mode = #tpu.pipeline_mode<synchronous>, transform_indices = @transform_5, window_bounds = array<i64: 1, 128>}, {pipeline_mode = #tpu.pipeline_mode<synchronous>, transform_indices = @transform_6, window_bounds = array<i64: 128, 128>}, {pipeline_mode = #tpu.pipeline_mode<synchronous>, transform_indices = @transform_7, window_bounds = array<i64: 1, 128>}, {transform_indices = @transform_8, window_bounds = array<i64: 16, 128>}]} {
    %c0 = arith.constant 0 : index
    %c0_0 = arith.constant 0 : index
    %0 = vector.load %arg1[%c0, %c0_0] : memref<16x10xbf16, #tpu.memory_space<vmem>>, vector<16x10xbf16>
    %c0_1 = arith.constant 0 : index
    %c0_2 = arith.constant 0 : index
    %1 = vector.load %arg2[%c0_1, %c0_2] : memref<10x128xbf16, #tpu.memory_space<vmem>>, vector<10x128xbf16>
    %cst = arith.constant dense<0.000000e+00> : vector<16x128xf32>
    %2 = tpu.matmul %0, %1, %cst {dimension_numbers = #tpu.dot_dimension_numbers<[1], [0], [0], [1], [0, 0, 1, 1], [], []>} : vector<16x10xbf16>, vector<10x128xbf16>, vector<16x128xf32> -> vector<16x128xf32>
    %3 = arith.mulf %2, %2 : vector<16x128xf32>
    %4 = arith.mulf %3, %2 : vector<16x128xf32>
    %cst_3 = arith.constant 4.471500e-02 : f32
    %5 = vector.broadcast %cst_3 : f32 to vector<16x128xf32>
    %6 = arith.mulf %5, %4 : vector<16x128xf32>
    %7 = arith.addf %2, %6 : vector<16x128xf32>
    %cst_4 = arith.constant 5.000000e-01 : f32
    %8 = vector.broadcast %cst_4 : f32 to vector<16x128xf32>
    %9 = arith.mulf %8, %2 : vector<16x128xf32>
    %cst_5 = arith.constant 0.797884583 : f32
    %10 = vector.broadcast %cst_5 : f32 to vector<16x128xf32>
    %11 = arith.mulf %10, %7 : vector<16x128xf32>
    %12 = math.tanh %11 : vector<16x128xf32>
    %cst_6 = arith.constant 1.000000e+00 : f32
    %13 = vector.broadcast %cst_6 : f32 to vector<16x128xf32>
    %14 = arith.addf %13, %12 : vector<16x128xf32>
    %15 = arith.mulf %9, %14 : vector<16x128xf32>
    %cst_7 = arith.constant dense<0.000000e+00> : vector<16xf32>
    %16 = vector.multi_reduction <add>, %15, %cst_7 [1] : vector<16x128xf32> to vector<16xf32>
    %17 = vector.shape_cast %16 : vector<16xf32> to vector<16x1xf32>
    %cst_8 = arith.constant 7.812500e-03 : f32
    %18 = vector.broadcast %cst_8 : f32 to vector<16x1xf32>
    %19 = arith.mulf %17, %18 : vector<16x1xf32>
    %20 = vector.broadcast %19 : vector<16x1xf32> to vector<16x128xf32>
    %21 = arith.subf %15, %20 : vector<16x128xf32>
    %22 = arith.mulf %21, %21 : vector<16x128xf32>
    %cst_9 = arith.constant dense<0.000000e+00> : vector<16xf32>
    %23 = vector.multi_reduction <add>, %22, %cst_9 [1] : vector<16x128xf32> to vector<16xf32>
    %24 = vector.shape_cast %23 : vector<16xf32> to vector<16x1xf32>
    %cst_10 = arith.constant 7.812500e-03 : f32
    %25 = vector.broadcast %cst_10 : f32 to vector<16x1xf32>
    %26 = arith.mulf %24, %25 : vector<16x1xf32>
    %cst_11 = arith.constant 9.99999974E-6 : f32
    %27 = vector.broadcast %cst_11 : f32 to vector<16x1xf32>
    %28 = arith.addf %26, %27 : vector<16x1xf32>
    %29 = math.rsqrt %28 : vector<16x1xf32>
    %30 = vector.broadcast %29 : vector<16x1xf32> to vector<16x128xf32>
    %31 = arith.mulf %21, %30 : vector<16x128xf32>
    %c0_12 = arith.constant 0 : index
    %c0_13 = arith.constant 0 : index
    %32 = vector.load %arg5[%c0_12, %c0_13] : memref<1x128xf32, #tpu.memory_space<vmem>>, vector<1x128xf32>
    %33 = vector.broadcast %32 : vector<1x128xf32> to vector<16x128xf32>
    %34 = arith.mulf %31, %33 : vector<16x128xf32>
    %c0_14 = arith.constant 0 : index
    %c0_15 = arith.constant 0 : index
    %35 = vector.load %arg6[%c0_14, %c0_15] : memref<1x128xf32, #tpu.memory_space<vmem>>, vector<1x128xf32>
    %36 = vector.broadcast %35 : vector<1x128xf32> to vector<16x128xf32>
    %37 = arith.addf %34, %36 : vector<16x128xf32>
    %38 = arith.addf %2, %37 : vector<16x128xf32>
    %39 = arith.truncf %38 : vector<16x128xf32> to vector<16x128xbf16>
    %c0_16 = arith.constant 0 : index
    %c0_17 = arith.constant 0 : index
    %40 = vector.load %arg3[%c0_16, %c0_17] : memref<128x128xbf16, #tpu.memory_space<vmem>>, vector<128x128xbf16>
    %cst_18 = arith.constant dense<0.000000e+00> : vector<16x128xf32>
    %41 = tpu.matmul %39, %40, %cst_18 {dimension_numbers = #tpu.dot_dimension_numbers<[1], [0], [0], [1], [0, 0, 1, 1], [], []>} : vector<16x128xbf16>, vector<128x128xbf16>, vector<16x128xf32> -> vector<16x128xf32>
    %c0_19 = arith.constant 0 : index
    %c0_20 = arith.constant 0 : index
    %42 = vector.load %arg4[%c0_19, %c0_20] : memref<1x128xf32, #tpu.memory_space<vmem>>, vector<1x128xf32>
    %43 = vector.broadcast %42 : vector<1x128xf32> to vector<16x128xf32>
    %44 = arith.addf %41, %43 : vector<16x128xf32>
    %45 = arith.mulf %44, %44 : vector<16x128xf32>
    %46 = arith.mulf %45, %44 : vector<16x128xf32>
    %cst_21 = arith.constant 4.471500e-02 : f32
    %47 = vector.broadcast %cst_21 : f32 to vector<16x128xf32>
    %48 = arith.mulf %47, %46 : vector<16x128xf32>
    %49 = arith.addf %44, %48 : vector<16x128xf32>
    %cst_22 = arith.constant 5.000000e-01 : f32
    %50 = vector.broadcast %cst_22 : f32 to vector<16x128xf32>
    %51 = arith.mulf %50, %44 : vector<16x128xf32>
    %cst_23 = arith.constant 0.797884583 : f32
    %52 = vector.broadcast %cst_23 : f32 to vector<16x128xf32>
    %53 = arith.mulf %52, %49 : vector<16x128xf32>
    %54 = math.tanh %53 : vector<16x128xf32>
    %cst_24 = arith.constant 1.000000e+00 : f32
    %55 = vector.broadcast %cst_24 : f32 to vector<16x128xf32>
    %56 = arith.addf %55, %54 : vector<16x128xf32>
    %57 = arith.mulf %51, %56 : vector<16x128xf32>
    %58 = arith.truncf %57 : vector<16x128xf32> to vector<16x128xbf16>
    %c0_25 = arith.constant 0 : index
    %c0_26 = arith.constant 0 : index
    %59 = vector.load %arg7[%c0_25, %c0_26] : memref<128x128xbf16, #tpu.memory_space<vmem>>, vector<128x128xbf16>
    %cst_27 = arith.constant dense<0.000000e+00> : vector<16x128xf32>
    %60 = tpu.matmul %58, %59, %cst_27 {dimension_numbers = #tpu.dot_dimension_numbers<[1], [0], [0], [1], [0, 0, 1, 1], [], []>} : vector<16x128xbf16>, vector<128x128xbf16>, vector<16x128xf32> -> vector<16x128xf32>
    %c0_28 = arith.constant 0 : index
    %c0_29 = arith.constant 0 : index
    %61 = vector.load %arg8[%c0_28, %c0_29] : memref<1x128xf32, #tpu.memory_space<vmem>>, vector<1x128xf32>
    %62 = vector.broadcast %61 : vector<1x128xf32> to vector<16x128xf32>
    %63 = arith.addf %60, %62 : vector<16x128xf32>
    %cst_30 = arith.constant dense<0xFF800000> : vector<16xf32>
    %64 = vector.multi_reduction <maximumf>, %63, %cst_30 [1] : vector<16x128xf32> to vector<16xf32>
    %65 = vector.shape_cast %64 : vector<16xf32> to vector<16x1xf32>
    %66 = vector.broadcast %65 : vector<16x1xf32> to vector<16x128xf32>
    %67 = arith.subf %63, %66 : vector<16x128xf32>
    %68 = math.exp %67 : vector<16x128xf32>
    %cst_31 = arith.constant dense<0.000000e+00> : vector<16xf32>
    %69 = vector.multi_reduction <add>, %68, %cst_31 [1] : vector<16x128xf32> to vector<16xf32>
    %70 = vector.shape_cast %69 : vector<16xf32> to vector<16x1xf32>
    %71 = math.log %70 : vector<16x1xf32>
    %72 = vector.broadcast %71 : vector<16x1xf32> to vector<16x128xf32>
    %73 = arith.subf %67, %72 : vector<16x128xf32>
    %74 = arith.truncf %73 : vector<16x128xf32> to vector<16x128xbf16>
    %c0_32 = arith.constant 0 : index
    %c0_33 = arith.constant 0 : index
    %75 = vector.load %arg9[%c0_32, %c0_33] : memref<16x128xbf16, #tpu.memory_space<vmem>>, vector<16x128xbf16>
    tpu.vector_store %arg9[%c0_32, %c0_33], %74 {strides = array<i32>} : memref<16x128xbf16, #tpu.memory_space<vmem>>, vector<16x128xbf16>,
    return
  }
  func.func @transform_0(%arg0: i32) -> (i32, i32) {
    %c0_i32 = arith.constant 0 : i32
    %c0_i32_0 = arith.constant 0 : i32
    return %arg0, %c0_i32 : i32, i32
  }
  func.func @transform_1(%arg0: i32) -> (i32, i32) {
    %c0_i32 = arith.constant 0 : i32
    %c0_i32_0 = arith.constant 0 : i32
    %c0_i32_1 = arith.constant 0 : i32
    return %c0_i32, %c0_i32_0 : i32, i32
  }
  func.func @transform_2(%arg0: i32) -> (i32, i32) {
    %c0_i32 = arith.constant 0 : i32
    %c0_i32_0 = arith.constant 0 : i32
    %c0_i32_1 = arith.constant 0 : i32
    return %c0_i32, %c0_i32_0 : i32, i32
  }
  func.func @transform_3(%arg0: i32) -> (i32, i32) {
    %c0_i32 = arith.constant 0 : i32
    %c0_i32_0 = arith.constant 0 : i32
    %c0_i32_1 = arith.constant 0 : i32
    return %c0_i32, %c0_i32_0 : i32, i32
  }
  func.func @transform_4(%arg0: i32) -> (i32, i32) {
    %c0_i32 = arith.constant 0 : i32
    %c0_i32_0 = arith.constant 0 : i32
    %c0_i32_1 = arith.constant 0 : i32
    return %c0_i32, %c0_i32_0 : i32, i32
  }
  func.func @transform_5(%arg0: i32) -> (i32, i32) {
    %c0_i32 = arith.constant 0 : i32
    %c0_i32_0 = arith.constant 0 : i32
    %c0_i32_1 = arith.constant 0 : i32
    return %c0_i32, %c0_i32_0 : i32, i32
  }
  func.func @transform_6(%arg0: i32) -> (i32, i32) {
    %c0_i32 = arith.constant 0 : i32
    %c0_i32_0 = arith.constant 0 : i32
    %c0_i32_1 = arith.constant 0 : i32
    return %c0_i32, %c0_i32_0 : i32, i32
  }
  func.func @transform_7(%arg0: i32) -> (i32, i32) {
    %c0_i32 = arith.constant 0 : i32
    %c0_i32_0 = arith.constant 0 : i32
    %c0_i32_1 = arith.constant 0 : i32
    return %c0_i32, %c0_i32_0 : i32, i32
  }
  func.func @transform_8(%arg0: i32) -> (i32, i32) {
    %c0_i32 = arith.constant 0 : i32
    %c0_i32_0 = arith.constant 0 : i32
    return %arg0, %c0_i32 : i32, i32
  }
}

</mosaic_0001>

<bundles_post_ra>
// kernel: tpu_custom_call.1
= control target key start
LH: loop header
LB: loop body
LE: loop exit
PB: predicated region body
PF: predicated region fallthrough
CT: control target
= control target key end

     0   :  { %13 = vsyncpa [#allocation3], 0  ;;  %s947_s0 = inlined_call_operand.hbm [shape: bf16[16,10], index: 0, kind: input, shape index: {}]   ;;  %s948_s1 = inlined_call_operand.hbm [shape: bf16[10,128], index: 1, kind: input, shape index: {}]   ;;  %s949_s2 = inlined_call_operand.hbm [shape: bf16[128,128], index: 2, kind: input, shape index: {}]   ;;  %s950_s3 = inlined_call_operand.vmem [shape: f32[1,128], index: 3, kind: input, shape index: {}]   ;;  %s951_s4 = inlined_call_operand.vmem [shape: f32[1,128], index: 4, kind: input, shape index: {}]   ;;  %s952_s5 = inlined_call_operand.vmem [shape: f32[1,128], index: 5, kind: input, shape index: {}]   ;;  %s953_s6 = inlined_call_operand.hbm [shape: bf16[128,128], index: 6, kind: input, shape index: {}]   ;;  %s954_s7 = inlined_call_operand.vmem [shape: f32[1,128], index: 7, kind: input, shape index: {}]   ;;  %s955_s8 = inlined_call_operand.hbm [shape: bf16[16,128], index: 8, kind: output, shape index: {}]  }
   0x1   :  { %14 = vsyncpa [#allocation6], 0 }
   0x2   :  { %15 = vsyncpa [#allocation9], 0 }
   0x3   :  { %16 = vsyncpa [#allocation4], 0  ;;  %s764_s27 = smov [#allocation5]   ;;  %s765_s29 = smov [#allocation2]  }
   0x4   :  { %s34_s28 = sshll.u32 %s764_s27, 4  ;;  %s22_s30 = sshll.u32 %s765_s29, 4  ;;  %s35_s28 = int_to_ptr.vmem [resolvable:$true] %s34_s28  ;;  %s818_s30 = int_to_ptr.vmem [resolvable:$true] %s22_s30 }
   0x5   :  { %s646_s11 = scalar_lea.hbm %s948_s1, 128 }
   0x6   :  { %p647_p0 = scmp.ne.s32.totalorder %s948_s1, %s646_s11  ;;  %p650_p1 = scmp.lt.u32.totalorder %s646_s11, %s948_s1 }
   0x8   :  { %p652_p2 = pnand %p650_p1, %p647_p0 }
   0xa   :  { %655 = shalt.err (!%p652_p2)
}
   0xb   :  { %s656_s16 = scalar_lea.vmem %s35_s28, 128  ;;  %p661_p4 = scmp.lt.s32.totalorder %s35_s28, %s35_s28 }
   0xc   :  { %p657_p3 = scmp.ne.s32.totalorder %s35_s28, %s656_s16  ;;  %p662_p5 = scmp.lt.s32.totalorder %s656_s16, %s656_s16 }
   0xe   :  { %p663_p6 = por %p662_p5, %p661_p4 }
  0x10   :  { %p664_p7 = pnand %p663_p6, %p657_p3 }
  0x12   :  { %667 = shalt.err (!%p664_p7)
}
  0x13   :  { %s766_s17 = smov 64   ;;  %s767_s18 = smov 4  }
  0x14   :  { %40 = dma.hbm_to_vmem [thread:$0]  %s948_s1, 128, %s35_s28, [#allocation6], %s766_s17, %s766_s17, %s767_s18  }
  0x15   :  { %s668_s23 = scalar_lea.hbm %s947_s0, 128 }
  0x16   :  { %p669_p8 = scmp.ne.s32.totalorder %s947_s0, %s668_s23  ;;  %p672_p9 = scmp.lt.u32.totalorder %s668_s23, %s947_s0 }
  0x18   :  { %p674_p10 = pnand %p672_p9, %p669_p8 }
  0x1a   :  { %677 = shalt.err (!%p674_p10)
}
  0x1b   :  { %s678_s29 = scalar_lea.vmem %s818_s30, 128  ;;  %p683_p12 = scmp.lt.s32.totalorder %s818_s30, %s818_s30 }
  0x1c   :  { %p679_p11 = scmp.ne.s32.totalorder %s818_s30, %s678_s29  ;;  %p684_p13 = scmp.lt.s32.totalorder %s678_s29, %s678_s29 }
  0x1e   :  { %p685_p0 = por %p684_p13, %p683_p12 }
  0x20   :  { %p686_p1 = pnand %p685_p0, %p679_p11 }
  0x22   :  { %689 = shalt.err (!%p686_p1)
}
  0x23   :  { %28 = dma.hbm_to_vmem [thread:$0]  %s947_s0, 128, %s818_s30, [#allocation3], %s766_s17, %s766_s17, %s767_s18  }
  0x24   :  { %s768_s9 = smov [#allocation7]   ;;  %s769_s11 = smov [#allocation8]  }
  0x25   :  { %s46_s10 = sshll.u32 %s768_s9, 4  ;;  %s64_s12 = sshll.u32 %s769_s11, 4  ;;  %s47_s10 = int_to_ptr.vmem [resolvable:$true] %s46_s10  ;;  %s855_s12 = int_to_ptr.vmem [resolvable:$true] %s64_s12 }
  0x26   :  { %s690_s15 = scalar_lea.hbm %s949_s2, 1024 }
  0x27   :  { %p691_p2 = scmp.ne.s32.totalorder %s949_s2, %s690_s15  ;;  %p694_p3 = scmp.lt.u32.totalorder %s690_s15, %s949_s2 }
  0x29   :  { %p696_p4 = pnand %p694_p3, %p691_p2 }
  0x2b   :  { %699 = shalt.err (!%p696_p4)
}
  0x2c   :  { %s700_s0 = scalar_lea.vmem %s47_s10, 1024  ;;  %p705_p6 = scmp.lt.s32.totalorder %s47_s10, %s47_s10 }
  0x2d   :  { %p701_p5 = scmp.ne.s32.totalorder %s47_s10, %s700_s0  ;;  %p706_p7 = scmp.lt.s32.totalorder %s700_s0, %s700_s0 }
  0x2f   :  { %p707_p8 = por %p706_p7, %p705_p6 }
  0x31   :  { %p708_p9 = pnand %p707_p8, %p701_p5 }
  0x33   :  { %711 = shalt.err (!%p708_p9)
}
  0x34   :  { %52 = dma.hbm_to_vmem [thread:$0]  %s949_s2, 1024, %s47_s10, [#allocation6], %s766_s17, %s766_s17, %s767_s18  }
  0x35   :  { %s712_s25 = scalar_lea.hbm %s953_s6, 1024 }
  0x36   :  { %p713_p10 = scmp.ne.s32.totalorder %s953_s6, %s712_s25  ;;  %p716_p11 = scmp.lt.u32.totalorder %s712_s25, %s953_s6 }
  0x38   :  { %p718_p12 = pnand %p716_p11, %p713_p10 }
  0x3a   :  { %721 = shalt.err (!%p718_p12)
}
  0x3b   :  { %s722_s28 = scalar_lea.vmem %s855_s12, 1024  ;;  %p727_p0 = scmp.lt.s32.totalorder %s855_s12, %s855_s12 }
  0x3c   :  { %p723_p13 = scmp.ne.s32.totalorder %s855_s12, %s722_s28  ;;  %p728_p1 = scmp.lt.s32.totalorder %s722_s28, %s722_s28 }
  0x3e   :  { %p729_p2 = por %p728_p1, %p727_p0 }
  0x40   :  { %p730_p3 = pnand %p729_p2, %p723_p13 }
  0x42   :  { %733 = shalt.err (!%p730_p3)
}
  0x43   :  { %70 = dma.hbm_to_vmem [thread:$0]  %s953_s6, 1024, %s855_s12, [#allocation9], %s766_s17, %s766_s17, %s767_s18  }
  0x44   :  { %756 = dma.done.wait [#allocation3], 128  }
  0x45   :  { %757 = vsyncadd [#allocation3], 4294967168 }
  0x46   :  { %758 = dma.done.wait [#allocation6], 1152  }
  0x47   :  { %759 = vsyncadd [#allocation6], 4294966144 }
  0x48   :  { %760 = dma.done.wait [#allocation9], 1024  }
  0x49   :  { %761 = vsyncadd [#allocation9], 4294966272  ;;  %v770_v0 = vmov 0.0   ;;  %vm771_vm0 = vmmov 0   ;;  %vm107_vm1 = vcmask 1044480   ;;  %vm103_vm2 = vcmask 80896  }
  0x4a   :  { %553 = vmatprep.subr.bf16.mxu0 %v770_v0  ;;  %555 = vmatprep.mubr.msk.bf16.mxu0 %vm771_vm0, %v770_v0  ;;  %v608_v1 = vld [vmem:[#allocation5] sm:$0x1f]   ;;  %v609_v3 = vld [vmem:[#allocation2] sm:$0xff]   ;;  %v610_v22 = vld [vmem:[#allocation7] sm:$0xff]   ;;  %v196_v45 = vlaneseq }
  0x4b   :  { %559 = vmatprep.subr.bf16.mxu1 %v770_v0  ;;  %575 = vmatprep.mubr.msk.bf16.mxu1 %vm771_vm0, %v770_v0  ;;  %v109_v2 = vsel %vm107_vm1, %v608_v1, 0  ;;  %v611_v32 = vld [vmem:[#allocation7 + $0x8] sm:$0xff]   ;;  %v612_v33 = vld [vmem:[#allocation7 + $0x10] sm:$0xff]   ;;  %v613_v34 = vld [vmem:[#allocation7 + $0x18] sm:$0xff]  }
  0x4c   :  { %554 = vmatpush3.bf16.msra.mxu0 %v109_v2  ;;  %560 = vmatpush3.bf16.msra.mxu1 %v610_v22  ;;  %v614_v35 = vld [vmem:[#allocation7 + $0x20] sm:$0xff]   ;;  %v615_v36 = vld [vmem:[#allocation7 + $0x28] sm:$0xff]   ;;  %v616_v37 = vld [vmem:[#allocation7 + $0x30] sm:$0xff]   ;;  %v197_v49 = vshrl.u32 %v196_v45, 7 }
  0x4d   :  { %579 = vmatprep.subr.bf16.mxu0 %v770_v0  ;;  %561 = vmatprep.subr.bf16.mxu1 %v770_v0  ;;  %v617_v38 = vld [vmem:[#allocation7 + $0x38] sm:$0xff]   ;;  %v191_v46 = vld [vmem:[%s951_s4] sm:$0x1]  ;;  %v618_v63 = vld [vmem:[#allocation8] sm:$0xff]  }
  0x4e   :  { %v201_v47 = vld [vmem:[%s952_s5] sm:$0x1]  ;;  %v192_v48 = vpack.c.bf16 %v191_v46, %v191_v46  ;;  %v198_v52 = vsub.s32 0, %v197_v49  ;;  %v619_v1 = vld [vmem:[#allocation8 + $0x8] sm:$0xff]  }
  0x4f   :  { %556 = vmatmul.mubr.msk.bf16.vlgmr.msra.gmra.mrb[0].mxu0 %vm103_vm2, %v609_v3  ;;  %v202_v50 = vpack.c.bf16 %v201_v47, %v201_v47  ;;  %v620_v2 = vld [vmem:[#allocation8 + $0x10] sm:$0xff]   ;;  %v621_v3 = vld [vmem:[#allocation8 + $0x18] sm:$0xff]  }
  0x50   :  { %595 = vmatprep.mubr.msk.bf16.mxu0 %vm771_vm0, %v770_v0  ;;  %562 = vmatpush3.bf16.msra.mxu1 %v611_v32  ;;  %v194_v51 = vpack.i.b16 %v192_v48, %v192_v48 }
  0x51   :  { %563 = vmatprep.subr.bf16.mxu1 %v770_v0  ;;  %v204_v54 = vpack.i.b16 %v202_v50, %v202_v50  ;;  %580 = vmatpush3.bf16.msra.mxu0 %v618_v63 }
  0x52   :  { %v199_v57 = vrot.slane %v194_v51, %v198_v52  ;;  %581 = vmatprep.subr.bf16.mxu0 %v770_v0 }
  0x53   :  { %v209_v59 = vrot.slane %v204_v54, %v198_v52 }
  0x54   :  { %564 = vmatpush3.bf16.msra.mxu1 %v612_v33 }
  0x55   :  { %565 = vmatprep.subr.bf16.mxu1 %v770_v0  ;;  %582 = vmatpush3.bf16.msra.mxu0 %v619_v1 }
  0x56   :  { %583 = vmatprep.subr.bf16.mxu0 %v770_v0 }
  0x58   :  { %566 = vmatpush3.bf16.msra.mxu1 %v613_v34 }
  0x59   :  { %567 = vmatprep.subr.bf16.mxu1 %v770_v0  ;;  %584 = vmatpush3.bf16.msra.mxu0 %v620_v2 }
  0x5a   :  { %585 = vmatprep.subr.bf16.mxu0 %v770_v0 }
  0x5c   :  { %568 = vmatpush3.bf16.msra.mxu1 %v614_v35 }
  0x5d   :  { %569 = vmatprep.subr.bf16.mxu1 %v770_v0  ;;  %586 = vmatpush3.bf16.msra.mxu0 %v621_v3 }
  0x5e   :  { %587 = vmatprep.subr.bf16.mxu0 %v770_v0 }
  0x60   :  { %570 = vmatpush3.bf16.msra.mxu1 %v615_v36 }
  0x61   :  { %571 = vmatprep.subr.bf16.mxu1 %v770_v0 }
  0x64   :  { %572 = vmatpush3.bf16.msra.mxu1 %v616_v37 }
  0x65   :  { %573 = vmatprep.subr.bf16.mxu1 %v770_v0 }
  0x68   :  { %574 = vmatpush3.bf16.msra.mxu1 %v617_v38 }
 0x122   :  { %v145_v4 = vpop.f32.mrb[0].mxu0 }
 0x123   :  { %v557_v5 = vpop.f32.mrb[1].mxu0 }
 0x124   :  { %v148_v6 = vpop.f32.mrb[2].mxu0  ;;  %v623_v5 = vld [vmem:[#allocation8 + $0x28] sm:$0xff]  }
 0x125   :  { %v898_v7 = vpack.c.bf16 %v148_v6, %v145_v4  ;;  %v558_v8 = vpop.f32.mrb[3].mxu0  ;;  %v622_v4 = vld [vmem:[#allocation8 + $0x20] sm:$0xff]   ;;  %v624_v6 = vld [vmem:[#allocation8 + $0x30] sm:$0xff]  }
 0x126   :  { %588 = vmatpush3.bf16.msra.mxu0 %v622_v4  ;;  %v318_v8 = vld [vmem:[%s950_s3] sm:$0x1] }
 0x127   :  { %v153_v9 = vmul.bf16 %v898_v7, %v898_v7  ;;  %589 = vmatprep.subr.bf16.mxu0 %v770_v0 }
 0x129   :  { %v154_v10 = vmul.bf16 %v153_v9, %v898_v7  ;;  %v319_v9 = vpack.c.bf16 %v318_v8, %v318_v8 }
 0x12a   :  { %590 = vmatpush3.bf16.msra.mxu0 %v623_v5 }
 0x12b   :  { %v155_v11 = vmul.bf16 1027030327, %v154_v10  ;;  %591 = vmatprep.subr.bf16.mxu0 %v770_v0  ;;  %v321_v10 = vpack.i.b16 %v319_v9, %v319_v9 }
 0x12d   :  { %v156_v12 = vadd.bf16 %v155_v11, %v898_v7 }
 0x12e   :  { %592 = vmatpush3.bf16.msra.mxu0 %v624_v6 }
 0x12f   :  { %v505_v13 = vmul.bf16 3217866700, %v156_v12  ;;  %593 = vmatprep.subr.bf16.mxu0 %v770_v0 }
 0x131   :  { %v160_v14 = vmul.bf16 1069105081, %v505_v13  ;;  %v326_v13 = vrot.slane %v321_v10, %v198_v52 }
 0x133   :  { %626 = vpow.bf16 %v160_v14 }
 0x13e   :  { %v627_v15 = vpop.eup %626 }
 0x13f   :  { %v162_v16 = vadd.bf16 1065369472, %v627_v15 }
 0x141   :  { %628 = vrcp.bf16 %v162_v16 }
 0x14c   :  { %v629_v17 = vpop.eup %628 }
 0x14d   :  { %v164_v18 = vmul.bf16 1065369472, %v629_v17 }
 0x14f   :  { %v165_v19 = vmul.bf16 %v164_v18, %v898_v7 }
 0x151   :  { %v166_v20 = vunpack.c.l.bf16 %v165_v19  ;;  %v167_v21 = vunpack.c.h.bf16 %v165_v19 }
 0x153   :  { %168 = vadd.xlane.f32.xlu0 %v166_v20 }
 0x157   :  { %170 = vadd.xlane.f32.xlu0 %v167_v21 }
 0x1e0   :  { %v169_v23 = vpop.xlane.xlu0 %168 }
 0x1e1   :  { %v172_v25 = vmul.f32 0.0078125, %v169_v23 }
 0x1e4   :  { %v171_v24 = vpop.xlane.xlu0 %170 }
 0x1e5   :  { %v173_v26 = vmul.f32 0.0078125, %v171_v24 }
 0x1e7   :  { %v174_v27 = vpack.c.bf16 %v173_v26, %v172_v25 }
 0x1e9   :  { %v175_v28 = vsub.bf16 %v165_v19, %v174_v27 }
 0x1eb   :  { %v176_v29 = vmul.bf16 %v175_v28, %v175_v28 }
 0x1ed   :  { %v177_v30 = vunpack.c.l.bf16 %v176_v29  ;;  %v178_v31 = vunpack.c.h.bf16 %v176_v29 }
 0x1ef   :  { %179 = vadd.xlane.f32.xlu1 %v177_v30 }
 0x1f3   :  { %181 = vadd.xlane.f32.xlu1 %v178_v31 }
 0x27c   :  { %v180_v39 = vpop.xlane.xlu1 %179 }
 0x27d   :  { %v183_v40 = vmul.f32 0.0078125, %v180_v39 }
 0x27f   :  { %v185_v41 = vadd.f32 1e-05, %v183_v40 }
 0x280   :  { %v182_v42 = vpop.xlane.xlu1 %181 }
 0x281   :  { %v184_v43 = vmul.f32 0.0078125, %v182_v42  ;;  %630 = vrsqrt.f32 %v185_v41 }
 0x283   :  { %v186_v44 = vadd.f32 1e-05, %v184_v43 }
 0x285   :  { %632 = vrsqrt.f32 %v186_v44 }
 0x28b   :  { %v631_v53 = vpop.eup %630 }
 0x28f   :  { %v633_v55 = vpop.eup %632 }
 0x290   :  { %v189_v56 = vpack.c.bf16 %v633_v55, %v631_v53 }
 0x292   :  { %v190_v58 = vmul.bf16 %v189_v56, %v175_v28  ;;  %v515_v28 = vld [vmem:[%s954_s7] ss:$0 sm:$0xff]  ;;  %s772_s7 = smov [#allocation10]  }
 0x293   :  { %s488_s14 = sshll.u32 %s772_s7, 4  ;;  %s489_s14 = int_to_ptr.vmem [resolvable:$true] %s488_s14 }
 0x294   :  { %v200_v60 = vmul.bf16 %v199_v57, %v190_v58  ;;  %s734_s15 = scalar_lea.vmem %s489_s14, 128  ;;  %p739_p5 = scmp.lt.s32.totalorder %s489_s14, %s489_s14 }
 0x295   :  { %p735_p4 = scmp.ne.s32.totalorder %s489_s14, %s734_s15  ;;  %p740_p6 = scmp.lt.s32.totalorder %s734_s15, %s734_s15 }
 0x296   :  { %v210_v61 = vadd.bf16 %v209_v59, %v200_v60 }
 0x297   :  { %p741_p7 = por %p740_p6, %p739_p5 }
 0x298   :  { %v211_v62 = vadd.bf16 %v210_v61, %v898_v7  ;;  %v625_v7 = vld [vmem:[#allocation8 + $0x38] sm:$0xff]  }
 0x299   :  { %594 = vmatpush3.bf16.msra.mxu0 %v625_v7  ;;  %p742_p8 = pnand %p741_p7, %p735_p4 }
 0x29a   :  { %576 = vmatmul.mubr.bf16.vlgmr.msra.gmra.mrb[0].mxu1 %v211_v62 }
 0x36d   :  { %v310_v11 = vpop.f32.mrb[0].mxu1 }
 0x36e   :  { %v577_v12 = vpop.f32.mrb[1].mxu1 }
 0x36f   :  { %v313_v14 = vpop.f32.mrb[2].mxu1 }
 0x370   :  { %v317_v15 = vpack.c.bf16 %v313_v14, %v310_v11  ;;  %v578_v16 = vpop.f32.mrb[3].mxu1 }
 0x372   :  { %v327_v17 = vadd.bf16 %v326_v13, %v317_v15 }
 0x374   :  { %v328_v18 = vmul.bf16 %v327_v17, %v327_v17 }
 0x376   :  { %v329_v19 = vmul.bf16 %v328_v18, %v327_v17 }
 0x378   :  { %v330_v20 = vmul.bf16 1027030327, %v329_v19 }
 0x37a   :  { %v331_v21 = vadd.bf16 %v330_v20, %v327_v17 }
 0x37c   :  { %v514_v22 = vmul.bf16 3217866700, %v331_v21 }
 0x37e   :  { %v335_v0 = vmul.bf16 1069105081, %v514_v22 }
 0x380   :  { %634 = vpow.bf16 %v335_v0 }
 0x38b   :  { %v635_v23 = vpop.eup %634 }
 0x38c   :  { %v337_v24 = vadd.bf16 1065369472, %v635_v23 }
 0x38e   :  { %636 = vrcp.bf16 %v337_v24 }
 0x399   :  { %v637_v25 = vpop.eup %636 }
 0x39a   :  { %v339_v26 = vmul.bf16 1065369472, %v637_v25 }
 0x39c   :  { %v340_v27 = vmul.bf16 %v339_v26, %v327_v17 }
 0x39e   :  { %596 = vmatmul.mubr.bf16.vlgmr.msra.gmra.mrb[4].mxu0 %v340_v27 }
 0x471   :  { %v446_v29 = vpop.f32.mrb[4].mxu0 }
 0x472   :  { %v447_v30 = vadd.f32 %v515_v28, %v446_v29  ;;  %v597_v31 = vpop.f32.mrb[5].mxu0 }
 0x473   :  { %v449_v32 = vpop.f32.mrb[6].mxu0 }
 0x474   :  { %v450_v33 = vadd.f32 %v515_v28, %v449_v32  ;;  %453 = vmax.xlane.f32.xlu0 %v447_v30  ;;  %v598_v34 = vpop.f32.mrb[7].mxu0 }
 0x476   :  { %455 = vmax.xlane.f32.xlu1 %v450_v33 }
 0x501   :  { %v454_v35 = vpop.xlane.xlu0 %453 }
 0x502   :  { %v457_v36 = vsub.f32 %v447_v30, %v454_v35 }
 0x503   :  { %v456_v37 = vpop.xlane.xlu1 %455 }
 0x504   :  { %v459_v38 = vmul.f32 1.442695, %v457_v36  ;;  %v458_v39 = vsub.f32 %v450_v33, %v456_v37 }
 0x506   :  { %638 = vpow2.f32 %v459_v38  ;;  %v461_v40 = vmul.f32 1.442695, %v458_v39 }
 0x508   :  { %640 = vpow2.f32 %v461_v40 }
 0x510   :  { %v639_v41 = vpop.eup %638 }
 0x511   :  { %463 = vadd.xlane.f32.xlu0 %v639_v41 }
 0x512   :  { %v641_v42 = vpop.eup %640 }
 0x513   :  { %465 = vadd.xlane.f32.xlu1 %v641_v42 }
 0x59e   :  { %v464_v43 = vpop.xlane.xlu0 %463 }
 0x59f   :  { %642 = vlog2.f32 %v464_v43 }
 0x5a0   :  { %v466_v44 = vpop.xlane.xlu1 %465 }
 0x5a1   :  { %644 = vlog2.f32 %v466_v44 }
 0x5a9   :  { %v643_v45 = vpop.eup %642 }
 0x5aa   :  { %v468_v46 = vmul.f32 0.6931472, %v643_v45 }
 0x5ab   :  { %v645_v47 = vpop.eup %644 }
 0x5ac   :  { %v470_v48 = vmul.f32 0.6931472, %v645_v47  ;;  %v471_v49 = vsub.f32 %v457_v36, %v468_v46 }
 0x5ae   :  { %v472_v50 = vsub.f32 %v458_v39, %v470_v48 }
 0x5b0   :  { %v531_v51 = vpack.c.bf16 %v472_v50, %v471_v49 }
 0x5b2   :  { %532 = vst [vmem:[#allocation10] sm:$0xff] %v531_v51  }
 0x5b3   :  { %745 = shalt.err (!%p742_p8)
}
 0x5b4   :  { %s746_s20 = scalar_lea.hbm %s955_s8, 128 }
 0x5b5   :  { %p747_p9 = scmp.ne.s32.totalorder %s955_s8, %s746_s20  ;;  %p750_p10 = scmp.lt.u32.totalorder %s746_s20, %s955_s8 }
 0x5b7   :  { %p752_p11 = pnand %p750_p10, %p747_p9 }
 0x5b9   :  { %755 = shalt.err (!%p752_p11)
}
 0x5ba   :  { %494 = dma.vmem_to_hbm [thread:$0]  %s489_s14, 128, %s955_s8, [#allocation4], %s766_s17, %s766_s17, %s767_s18  }
 0x5bb   :  { %762 = dma.done.wait [#allocation4], 128  }
 0x5bc   :  { %763 = vsyncadd [#allocation4], 4294967168 }
 0x5bd   :  { %498 = vsyncpa [#allocation3], 1 }
 0x5be   :  { %499 = vsyncpa [#allocation6], 1 }
 0x5bf   :  { %500 = vsyncpa [#allocation9], 1 }
 0x5c0   :  { %501 = vsyncpa [#allocation4], 1 }

// kernel: tpu_custom_call.1
= control target key start
LH: loop header
LB: loop body
LE: loop exit
PB: predicated region body
PF: predicated region fallthrough
CT: control target
= control target key end

     0   :  { %13 = vsyncpa [#allocation3], 0  ;;  %s956_s0 = inlined_call_operand.hbm [shape: bf16[16,10], index: 0, kind: input, shape index: {}]   ;;  %s957_s1 = inlined_call_operand.hbm [shape: bf16[10,128], index: 1, kind: input, shape index: {}]   ;;  %s958_s2 = inlined_call_operand.hbm [shape: bf16[128,128], index: 2, kind: input, shape index: {}]   ;;  %s959_s3 = inlined_call_operand.vmem [shape: f32[1,128], index: 3, kind: input, shape index: {}]   ;;  %s960_s4 = inlined_call_operand.vmem [shape: f32[1,128], index: 4, kind: input, shape index: {}]   ;;  %s961_s5 = inlined_call_operand.vmem [shape: f32[1,128], index: 5, kind: input, shape index: {}]   ;;  %s962_s6 = inlined_call_operand.hbm [shape: bf16[128,128], index: 6, kind: input, shape index: {}]   ;;  %s963_s7 = inlined_call_operand.vmem [shape: f32[1,128], index: 7, kind: input, shape index: {}]   ;;  %s964_s8 = inlined_call_operand.hbm [shape: bf16[16,128], index: 8, kind: output, shape index: {}]  }
   0x1   :  { %14 = vsyncpa [#allocation6], 0 }
   0x2   :  { %15 = vsyncpa [#allocation9], 0 }
   0x3   :  { %16 = vsyncpa [#allocation4], 0  ;;  %s765_s27 = smov [#allocation5]   ;;  %s766_s29 = smov [#allocation2]  }
   0x4   :  { %s34_s28 = sshll.u32 %s765_s27, 4  ;;  %s22_s30 = sshll.u32 %s766_s29, 4  ;;  %s35_s28 = int_to_ptr.vmem [resolvable:$true] %s34_s28  ;;  %s819_s30 = int_to_ptr.vmem [resolvable:$true] %s22_s30 }
   0x5   :  { %s647_s11 = scalar_lea.hbm %s957_s1, 128 }
   0x6   :  { %p648_p0 = scmp.ne.s32.totalorder %s957_s1, %s647_s11  ;;  %p651_p1 = scmp.lt.u32.totalorder %s647_s11, %s957_s1 }
   0x8   :  { %p653_p2 = pnand %p651_p1, %p648_p0 }
   0xa   :  { %656 = shalt.err (!%p653_p2)
}
   0xb   :  { %s657_s16 = scalar_lea.vmem %s35_s28, 128  ;;  %p662_p4 = scmp.lt.s32.totalorder %s35_s28, %s35_s28 }
   0xc   :  { %p658_p3 = scmp.ne.s32.totalorder %s35_s28, %s657_s16  ;;  %p663_p5 = scmp.lt.s32.totalorder %s657_s16, %s657_s16 }
   0xe   :  { %p664_p6 = por %p663_p5, %p662_p4 }
  0x10   :  { %p665_p7 = pnand %p664_p6, %p658_p3 }
  0x12   :  { %668 = shalt.err (!%p665_p7)
}
  0x13   :  { %s767_s17 = smov 64   ;;  %s768_s18 = smov 4  }
  0x14   :  { %40 = dma.hbm_to_vmem [thread:$0]  %s957_s1, 128, %s35_s28, [#allocation6], %s767_s17, %s767_s17, %s768_s18  }
  0x15   :  { %s669_s23 = scalar_lea.hbm %s956_s0, 128 }
  0x16   :  { %p670_p8 = scmp.ne.s32.totalorder %s956_s0, %s669_s23  ;;  %p673_p9 = scmp.lt.u32.totalorder %s669_s23, %s956_s0 }
  0x18   :  { %p675_p10 = pnand %p673_p9, %p670_p8 }
  0x1a   :  { %678 = shalt.err (!%p675_p10)
}
  0x1b   :  { %s679_s29 = scalar_lea.vmem %s819_s30, 128  ;;  %p684_p12 = scmp.lt.s32.totalorder %s819_s30, %s819_s30 }
  0x1c   :  { %p680_p11 = scmp.ne.s32.totalorder %s819_s30, %s679_s29  ;;  %p685_p13 = scmp.lt.s32.totalorder %s679_s29, %s679_s29 }
  0x1e   :  { %p686_p0 = por %p685_p13, %p684_p12 }
  0x20   :  { %p687_p1 = pnand %p686_p0, %p680_p11 }
  0x22   :  { %690 = shalt.err (!%p687_p1)
}
  0x23   :  { %28 = dma.hbm_to_vmem [thread:$0]  %s956_s0, 128, %s819_s30, [#allocation3], %s767_s17, %s767_s17, %s768_s18  }
  0x24   :  { %s769_s9 = smov [#allocation7]   ;;  %s770_s11 = smov [#allocation8]  }
  0x25   :  { %s46_s10 = sshll.u32 %s769_s9, 4  ;;  %s64_s12 = sshll.u32 %s770_s11, 4  ;;  %s47_s10 = int_to_ptr.vmem [resolvable:$true] %s46_s10  ;;  %s856_s12 = int_to_ptr.vmem [resolvable:$true] %s64_s12 }
  0x26   :  { %s691_s15 = scalar_lea.hbm %s958_s2, 1024 }
  0x27   :  { %p692_p2 = scmp.ne.s32.totalorder %s958_s2, %s691_s15  ;;  %p695_p3 = scmp.lt.u32.totalorder %s691_s15, %s958_s2 }
  0x29   :  { %p697_p4 = pnand %p695_p3, %p692_p2 }
  0x2b   :  { %700 = shalt.err (!%p697_p4)
}
  0x2c   :  { %s701_s0 = scalar_lea.vmem %s47_s10, 1024  ;;  %p706_p6 = scmp.lt.s32.totalorder %s47_s10, %s47_s10 }
  0x2d   :  { %p702_p5 = scmp.ne.s32.totalorder %s47_s10, %s701_s0  ;;  %p707_p7 = scmp.lt.s32.totalorder %s701_s0, %s701_s0 }
  0x2f   :  { %p708_p8 = por %p707_p7, %p706_p6 }
  0x31   :  { %p709_p9 = pnand %p708_p8, %p702_p5 }
  0x33   :  { %712 = shalt.err (!%p709_p9)
}
  0x34   :  { %52 = dma.hbm_to_vmem [thread:$0]  %s958_s2, 1024, %s47_s10, [#allocation6], %s767_s17, %s767_s17, %s768_s18  }
  0x35   :  { %s713_s25 = scalar_lea.hbm %s962_s6, 1024 }
  0x36   :  { %p714_p10 = scmp.ne.s32.totalorder %s962_s6, %s713_s25  ;;  %p717_p11 = scmp.lt.u32.totalorder %s713_s25, %s962_s6 }
  0x38   :  { %p719_p12 = pnand %p717_p11, %p714_p10 }
  0x3a   :  { %722 = shalt.err (!%p719_p12)
}
  0x3b   :  { %s723_s28 = scalar_lea.vmem %s856_s12, 1024  ;;  %p728_p0 = scmp.lt.s32.totalorder %s856_s12, %s856_s12 }
  0x3c   :  { %p724_p13 = scmp.ne.s32.totalorder %s856_s12, %s723_s28  ;;  %p729_p1 = scmp.lt.s32.totalorder %s723_s28, %s723_s28 }
  0x3e   :  { %p730_p2 = por %p729_p1, %p728_p0 }
  0x40   :  { %p731_p3 = pnand %p730_p2, %p724_p13 }
  0x42   :  { %734 = shalt.err (!%p731_p3)
}
  0x43   :  { %70 = dma.hbm_to_vmem [thread:$0]  %s962_s6, 1024, %s856_s12, [#allocation9], %s767_s17, %s767_s17, %s768_s18  }
  0x44   :  { %757 = dma.done.wait [#allocation3], 128  }
  0x45   :  { %758 = vsyncadd [#allocation3], 4294967168 }
  0x46   :  { %759 = dma.done.wait [#allocation6], 1152  }
  0x47   :  { %760 = vsyncadd [#allocation6], 4294966144 }
  0x48   :  { %761 = dma.done.wait [#allocation9], 1024  }
  0x49   :  { %762 = vsyncadd [#allocation9], 4294966272  ;;  %v771_v0 = vmov 0.0   ;;  %vm772_vm0 = vmmov 0   ;;  %vm104_vm1 = vcmask 1044480   ;;  %vm100_vm2 = vcmask 80896  }
  0x4a   :  { %554 = vmatprep.subr.bf16.mxu0 %v771_v0  ;;  %556 = vmatprep.mubr.msk.bf16.mxu0 %vm772_vm0, %v771_v0  ;;  %v609_v1 = vld [vmem:[#allocation5] sm:$0x1f]   ;;  %v610_v3 = vld [vmem:[#allocation2] sm:$0xff]   ;;  %v611_v26 = vld [vmem:[#allocation7] sm:$0xff]  }
  0x4b   :  { %560 = vmatprep.subr.bf16.mxu1 %v771_v0  ;;  %576 = vmatprep.mubr.msk.bf16.mxu1 %vm772_vm0, %v771_v0  ;;  %v106_v2 = vsel %vm104_vm1, %v609_v1, 0  ;;  %v612_v35 = vld [vmem:[#allocation7 + $0x8] sm:$0xff]   ;;  %v613_v36 = vld [vmem:[#allocation7 + $0x10] sm:$0xff]   ;;  %v614_v37 = vld [vmem:[#allocation7 + $0x18] sm:$0xff]  }
  0x4c   :  { %555 = vmatpush3.bf16.msra.mxu0 %v106_v2  ;;  %561 = vmatpush3.bf16.msra.mxu1 %v611_v26  ;;  %v615_v38 = vld [vmem:[#allocation7 + $0x20] sm:$0xff]   ;;  %v616_v39 = vld [vmem:[#allocation7 + $0x28] sm:$0xff]   ;;  %v617_v40 = vld [vmem:[#allocation7 + $0x30] sm:$0xff]  }
  0x4d   :  { %580 = vmatprep.subr.bf16.mxu0 %v771_v0  ;;  %562 = vmatprep.subr.bf16.mxu1 %v771_v0  ;;  %v618_v41 = vld [vmem:[#allocation7 + $0x38] sm:$0xff]   ;;  %v505_v49 = vld [vmem:[%s960_s4] ss:$0 sm:$0xff]  ;;  %v619_v61 = vld [vmem:[#allocation8] sm:$0xff]  }
  0x4e   :  { %v506_v53 = vld [vmem:[%s961_s5] ss:$0 sm:$0xff]  ;;  %v620_v62 = vld [vmem:[#allocation8 + $0x8] sm:$0xff]   ;;  %v622_v1 = vld [vmem:[#allocation8 + $0x18] sm:$0xff]  }
  0x4f   :  { %557 = vmatmul.mubr.msk.bf16.vlgmr.msra.gmra.mrb[0].mxu0 %vm100_vm2, %v610_v3  ;;  %v621_v63 = vld [vmem:[#allocation8 + $0x10] sm:$0xff]   ;;  %v623_v2 = vld [vmem:[#allocation8 + $0x20] sm:$0xff]   ;;  %v624_v3 = vld [vmem:[#allocation8 + $0x28] sm:$0xff]  }
  0x50   :  { %596 = vmatprep.mubr.msk.bf16.mxu0 %vm772_vm0, %v771_v0  ;;  %563 = vmatpush3.bf16.msra.mxu1 %v612_v35 }
  0x51   :  { %564 = vmatprep.subr.bf16.mxu1 %v771_v0  ;;  %581 = vmatpush3.bf16.msra.mxu0 %v619_v61 }
  0x52   :  { %582 = vmatprep.subr.bf16.mxu0 %v771_v0 }
  0x54   :  { %565 = vmatpush3.bf16.msra.mxu1 %v613_v36 }
  0x55   :  { %566 = vmatprep.subr.bf16.mxu1 %v771_v0  ;;  %583 = vmatpush3.bf16.msra.mxu0 %v620_v62 }
  0x56   :  { %584 = vmatprep.subr.bf16.mxu0 %v771_v0 }
  0x58   :  { %567 = vmatpush3.bf16.msra.mxu1 %v614_v37 }
  0x59   :  { %568 = vmatprep.subr.bf16.mxu1 %v771_v0  ;;  %585 = vmatpush3.bf16.msra.mxu0 %v621_v63 }
  0x5a   :  { %586 = vmatprep.subr.bf16.mxu0 %v771_v0 }
  0x5c   :  { %569 = vmatpush3.bf16.msra.mxu1 %v615_v38 }
  0x5d   :  { %570 = vmatprep.subr.bf16.mxu1 %v771_v0  ;;  %587 = vmatpush3.bf16.msra.mxu0 %v622_v1 }
  0x5e   :  { %588 = vmatprep.subr.bf16.mxu0 %v771_v0 }
  0x60   :  { %571 = vmatpush3.bf16.msra.mxu1 %v616_v39 }
  0x61   :  { %572 = vmatprep.subr.bf16.mxu1 %v771_v0  ;;  %589 = vmatpush3.bf16.msra.mxu0 %v623_v2 }
  0x62   :  { %590 = vmatprep.subr.bf16.mxu0 %v771_v0 }
  0x64   :  { %573 = vmatpush3.bf16.msra.mxu1 %v617_v40 }
  0x65   :  { %574 = vmatprep.subr.bf16.mxu1 %v771_v0  ;;  %591 = vmatpush3.bf16.msra.mxu0 %v624_v3 }
  0x66   :  { %592 = vmatprep.subr.bf16.mxu0 %v771_v0 }
  0x68   :  { %575 = vmatpush3.bf16.msra.mxu1 %v618_v41 }
 0x122   :  { %v899_v4 = vpop.f32.mrb[0].mxu0 }
 0x123   :  { %v149_v5 = vmul.f32 %v899_v4, %v899_v4  ;;  %v558_v6 = vpop.f32.mrb[1].mxu0  ;;  %v157_v19 = vmul.f32 0.5, %v899_v4 }
 0x124   :  { %v903_v7 = vpop.f32.mrb[2].mxu0  ;;  %v507_v6 = vld [vmem:[%s959_s3] ss:$0 sm:$0xff] }
 0x125   :  { %v151_v8 = vmul.f32 %v149_v5, %v899_v4  ;;  %v150_v9 = vmul.f32 %v903_v7, %v903_v7  ;;  %v559_v10 = vpop.f32.mrb[3].mxu0  ;;  %v158_v24 = vmul.f32 0.5, %v903_v7  ;;  %v626_v5 = vld [vmem:[#allocation8 + $0x38] sm:$0xff]  }
 0x127   :  { %v153_v11 = vmul.f32 0.044715, %v151_v8  ;;  %v152_v12 = vmul.f32 %v150_v9, %v903_v7 }
 0x129   :  { %v154_v13 = vmul.f32 0.044715, %v152_v12  ;;  %v155_v14 = vadd.f32 %v153_v11, %v899_v4 }
 0x12b   :  { %v159_v15 = vmul.f32 0.7978846, %v155_v14  ;;  %v156_v16 = vadd.f32 %v154_v13, %v903_v7 }
 0x12d   :  { %627 = vtanh.f32 %v159_v15  ;;  %v160_v17 = vmul.f32 0.7978846, %v156_v16 }
 0x12f   :  { %629 = vtanh.f32 %v160_v17 }
 0x137   :  { %v628_v18 = vpop.eup %627 }
 0x138   :  { %v163_v20 = vadd.f32 1.0, %v628_v18 }
 0x139   :  { %v630_v21 = vpop.eup %629 }
 0x13a   :  { %v165_v22 = vmul.f32 %v163_v20, %v157_v19  ;;  %v164_v23 = vadd.f32 1.0, %v630_v21 }
 0x13c   :  { %167 = vadd.xlane.f32.xlu0 %v165_v22  ;;  %v166_v25 = vmul.f32 %v164_v23, %v158_v24 }
 0x140   :  { %169 = vadd.xlane.f32.xlu0 %v166_v25 }
 0x1c9   :  { %v168_v27 = vpop.xlane.xlu0 %167 }
 0x1ca   :  { %v171_v28 = vmul.f32 0.0078125, %v168_v27 }
 0x1cc   :  { %v173_v29 = vsub.f32 %v165_v22, %v171_v28 }
 0x1cd   :  { %v170_v30 = vpop.xlane.xlu0 %169 }
 0x1ce   :  { %v172_v31 = vmul.f32 0.0078125, %v170_v30  ;;  %v175_v32 = vmul.f32 %v173_v29, %v173_v29 }
 0x1d0   :  { %v174_v33 = vsub.f32 %v166_v25, %v172_v31  ;;  %177 = vadd.xlane.f32.xlu1 %v175_v32  ;;  %v516_v31 = vld [vmem:[%s963_s7] ss:$0 sm:$0xff]  ;;  %s773_s7 = smov [#allocation10]  }
 0x1d1   :  { %s488_s14 = sshll.u32 %s773_s7, 4  ;;  %s489_s14 = int_to_ptr.vmem [resolvable:$true] %s488_s14 }
 0x1d2   :  { %v176_v34 = vmul.f32 %v174_v33, %v174_v33  ;;  %s735_s15 = scalar_lea.vmem %s489_s14, 128  ;;  %p740_p5 = scmp.lt.s32.totalorder %s489_s14, %s489_s14 }
 0x1d3   :  { %p736_p4 = scmp.ne.s32.totalorder %s489_s14, %s735_s15  ;;  %p741_p6 = scmp.lt.s32.totalorder %s735_s15, %s735_s15 }
 0x1d4   :  { %179 = vadd.xlane.f32.xlu1 %v176_v34 }
 0x1d5   :  { %p742_p7 = por %p741_p6, %p740_p5 }
 0x1d7   :  { %p743_p8 = pnand %p742_p7, %p736_p4 }
 0x25d   :  { %v178_v42 = vpop.xlane.xlu1 %177 }
 0x25e   :  { %v181_v43 = vmul.f32 0.0078125, %v178_v42 }
 0x260   :  { %v183_v44 = vadd.f32 1e-05, %v181_v43 }
 0x261   :  { %v180_v45 = vpop.xlane.xlu1 %179 }
 0x262   :  { %631 = vrsqrt.f32 %v183_v44  ;;  %v182_v46 = vmul.f32 0.0078125, %v180_v45 }
 0x264   :  { %v184_v47 = vadd.f32 1e-05, %v182_v46 }
 0x266   :  { %633 = vrsqrt.f32 %v184_v47 }
 0x26c   :  { %v632_v48 = vpop.eup %631 }
 0x26d   :  { %v187_v50 = vmul.f32 %v632_v48, %v173_v29 }
 0x26f   :  { %v196_v51 = vmul.f32 %v505_v49, %v187_v50 }
 0x270   :  { %v634_v52 = vpop.eup %633 }
 0x271   :  { %v188_v54 = vmul.f32 %v634_v52, %v174_v33  ;;  %v205_v56 = vadd.f32 %v506_v53, %v196_v51 }
 0x273   :  { %v197_v55 = vmul.f32 %v505_v49, %v188_v54  ;;  %v207_v58 = vadd.f32 %v205_v56, %v899_v4  ;;  %v625_v4 = vld [vmem:[#allocation8 + $0x30] sm:$0xff]  }
 0x274   :  { %593 = vmatpush3.bf16.msra.mxu0 %v625_v4 }
 0x275   :  { %v206_v57 = vadd.f32 %v506_v53, %v197_v55  ;;  %594 = vmatprep.subr.bf16.mxu0 %v771_v0 }
 0x277   :  { %v208_v59 = vadd.f32 %v206_v57, %v903_v7 }
 0x278   :  { %595 = vmatpush3.bf16.msra.mxu0 %v626_v5 }
 0x279   :  { %v209_v60 = vpack.c.bf16 %v208_v59, %v207_v58 }
 0x27b   :  { %577 = vmatmul.mubr.bf16.vlgmr.msra.gmra.mrb[0].mxu1 %v209_v60 }
 0x34e   :  { %v315_v7 = vpop.f32.mrb[0].mxu1 }
 0x34f   :  { %v316_v8 = vadd.f32 %v507_v6, %v315_v7  ;;  %v578_v9 = vpop.f32.mrb[1].mxu1 }
 0x350   :  { %v318_v10 = vpop.f32.mrb[2].mxu1 }
 0x351   :  { %v322_v11 = vmul.f32 %v316_v8, %v316_v8  ;;  %v319_v12 = vadd.f32 %v507_v6, %v318_v10  ;;  %v579_v13 = vpop.f32.mrb[3].mxu1  ;;  %v330_v25 = vmul.f32 0.5, %v316_v8 }
 0x353   :  { %v324_v14 = vmul.f32 %v322_v11, %v316_v8  ;;  %v323_v15 = vmul.f32 %v319_v12, %v319_v12  ;;  %v331_v26 = vmul.f32 0.5, %v319_v12 }
 0x355   :  { %v326_v16 = vmul.f32 0.044715, %v324_v14  ;;  %v325_v17 = vmul.f32 %v323_v15, %v319_v12 }
 0x357   :  { %v328_v18 = vadd.f32 %v326_v16, %v316_v8  ;;  %v327_v19 = vmul.f32 0.044715, %v325_v17 }
 0x359   :  { %v332_v20 = vmul.f32 0.7978846, %v328_v18  ;;  %v329_v0 = vadd.f32 %v327_v19, %v319_v12 }
 0x35b   :  { %635 = vtanh.f32 %v332_v20  ;;  %v333_v21 = vmul.f32 0.7978846, %v329_v0 }
 0x35d   :  { %637 = vtanh.f32 %v333_v21 }
 0x365   :  { %v636_v22 = vpop.eup %635 }
 0x366   :  { %v336_v23 = vadd.f32 1.0, %v636_v22 }
 0x367   :  { %v638_v24 = vpop.eup %637 }
 0x368   :  { %v337_v27 = vadd.f32 1.0, %v638_v24  ;;  %v338_v28 = vmul.f32 %v336_v23, %v330_v25 }
 0x36a   :  { %v339_v29 = vmul.f32 %v337_v27, %v331_v26 }
 0x36c   :  { %v340_v30 = vpack.c.bf16 %v339_v29, %v338_v28 }
 0x36e   :  { %597 = vmatmul.mubr.bf16.vlgmr.msra.gmra.mrb[4].mxu0 %v340_v30 }
 0x441   :  { %v446_v32 = vpop.f32.mrb[4].mxu0 }
 0x442   :  { %v447_v33 = vadd.f32 %v516_v31, %v446_v32  ;;  %v598_v34 = vpop.f32.mrb[5].mxu0 }
 0x443   :  { %v449_v35 = vpop.f32.mrb[6].mxu0 }
 0x444   :  { %v450_v36 = vadd.f32 %v516_v31, %v449_v35  ;;  %453 = vmax.xlane.f32.xlu0 %v447_v33  ;;  %v599_v37 = vpop.f32.mrb[7].mxu0 }
 0x446   :  { %455 = vmax.xlane.f32.xlu1 %v450_v36 }
 0x4d1   :  { %v454_v38 = vpop.xlane.xlu0 %453 }
 0x4d2   :  { %v457_v39 = vsub.f32 %v447_v33, %v454_v38 }
 0x4d3   :  { %v456_v40 = vpop.xlane.xlu1 %455 }
 0x4d4   :  { %v459_v41 = vmul.f32 1.442695, %v457_v39  ;;  %v458_v42 = vsub.f32 %v450_v36, %v456_v40 }
 0x4d6   :  { %639 = vpow2.f32 %v459_v41  ;;  %v461_v43 = vmul.f32 1.442695, %v458_v42 }
 0x4d8   :  { %641 = vpow2.f32 %v461_v43 }
 0x4e0   :  { %v640_v44 = vpop.eup %639 }
 0x4e1   :  { %463 = vadd.xlane.f32.xlu0 %v640_v44 }
 0x4e2   :  { %v642_v45 = vpop.eup %641 }
 0x4e3   :  { %465 = vadd.xlane.f32.xlu1 %v642_v45 }
 0x56e   :  { %v464_v46 = vpop.xlane.xlu0 %463 }
 0x56f   :  { %643 = vlog2.f32 %v464_v46 }
 0x570   :  { %v466_v47 = vpop.xlane.xlu1 %465 }
 0x571   :  { %645 = vlog2.f32 %v466_v47 }
 0x579   :  { %v644_v48 = vpop.eup %643 }
 0x57a   :  { %v468_v49 = vmul.f32 0.6931472, %v644_v48 }
 0x57b   :  { %v646_v50 = vpop.eup %645 }
 0x57c   :  { %v470_v51 = vmul.f32 0.6931472, %v646_v50  ;;  %v471_v52 = vsub.f32 %v457_v39, %v468_v49 }
 0x57e   :  { %v472_v53 = vsub.f32 %v458_v42, %v470_v51 }
 0x580   :  { %v532_v54 = vpack.c.bf16 %v472_v53, %v471_v52 }
 0x582   :  { %533 = vst [vmem:[#allocation10] sm:$0xff] %v532_v54  }
 0x583   :  { %746 = shalt.err (!%p743_p8)
}
 0x584   :  { %s747_s20 = scalar_lea.hbm %s964_s8, 128 }
 0x585   :  { %p748_p9 = scmp.ne.s32.totalorder %s964_s8, %s747_s20  ;;  %p751_p10 = scmp.lt.u32.totalorder %s747_s20, %s964_s8 }
 0x587   :  { %p753_p11 = pnand %p751_p10, %p748_p9 }
 0x589   :  { %756 = shalt.err (!%p753_p11)
}
 0x58a   :  { %494 = dma.vmem_to_hbm [thread:$0]  %s489_s14, 128, %s964_s8, [#allocation4], %s767_s17, %s767_s17, %s768_s18  }
 0x58b   :  { %763 = dma.done.wait [#allocation4], 128  }
 0x58c   :  { %764 = vsyncadd [#allocation4], 4294967168 }
 0x58d   :  { %498 = vsyncpa [#allocation3], 1 }
 0x58e   :  { %499 = vsyncpa [#allocation6], 1 }
 0x58f   :  { %500 = vsyncpa [#allocation9], 1 }
 0x590   :  { %501 = vsyncpa [#allocation4], 1 }

</bundles_post_ra>
